<compile_context>
chip_gen: v6e
topology: v6e:2x2x1
jax: 0.10.0
libtpu: 0.0.40
codegen_flags: <defaults>
</compile_context>

<pallas_src>
import jax
import jax.numpy as jnp
from jax.experimental import pallas as pl
from jax.experimental.pallas import tpu as pltpu


def sgc_kernel(s_ref, x_ref, w_ref, b_ref, out_ref):
    # In-kernel bf16 casts for the MXU operands (no wrapper converts).
    s = s_ref[...]                                # [N, N] bf16 (graph-static)
    x = x_ref[...].astype(jnp.bfloat16)           # [N, F]
    w = w_ref[...].astype(jnp.bfloat16)           # [F, C]

    # Linear first: (S^2 x) W == S^2 (x W)  — exact, halves+ MXU FLOPs and
    # keeps both propagated intermediates at [N, C].
    xw = jnp.dot(x, w, preferred_element_type=jnp.float32)                 # [N, C]
    p1 = jnp.dot(s, xw.astype(jnp.bfloat16),
                 preferred_element_type=jnp.float32)                       # [N, C]
    p2 = jnp.dot(s, p1.astype(jnp.bfloat16),
                 preferred_element_type=jnp.float32)                       # [N, C]

    z = p2 + b_ref[...]                           # bias once, f32

    # Numerically stable log_softmax over classes (axis=1), all in f32.
    m = jnp.max(z, axis=-1, keepdims=True)
    zs = z - m
    lse = jnp.log(jnp.sum(jnp.exp(zs), axis=-1, keepdims=True))
    out_ref[...] = zs - lse


def sgc_forward(x, s_bf16, w, b):
    """x: [N, F] f32, s_bf16: [N, N] bf16, w: [F, C] f32, b: [1, C] f32."""
    n = x.shape[0]
    c = w.shape[1]
    return pl.pallas_call(
        sgc_kernel,
        out_shape=jax.ShapeDtypeStruct((n, c), jnp.float32),
        in_specs=[pl.BlockSpec(memory_space=pltpu.MemorySpace.VMEM)] * 4,
        out_specs=pl.BlockSpec(memory_space=pltpu.MemorySpace.VMEM),
    )(s_bf16, x, w, b)


def build_sgc_propagation(edge_index, num_nodes):
    """Dense S = D^{-1/2} (A + I) D^{-1/2}, computed in f32, stored bf16.

    Note: parallel (duplicate) edges are deduped here via .set(1.0); PyG's
    gcn_norm on a coalesced multigraph would sum duplicate unit weights.
    """
    row, col = edge_index
    a = jnp.zeros((num_nodes, num_nodes), jnp.float32).at[row, col].set(1.0)
    a = jnp.maximum(a, jnp.eye(num_nodes, dtype=jnp.float32))   # add self loops
    deg = a.sum(axis=1)
    dinv = jnp.where(deg > 0, 1.0 / jnp.sqrt(deg), 0.0)
    s = dinv[:, None] * a * dinv[None, :]
    # Graph-static: quantize to bf16 once; it only ever feeds the MXU.
    return s.astype(jnp.bfloat16)


if __name__ == "__main__":
    N, F_IN, C, E = 64, 16, 8, 192   # nodes, num_features, num_classes, edges

    key = jax.random.PRNGKey(0)
    kx, ke, kw = jax.random.split(key, 3)

    x = jax.random.normal(kx, (N, F_IN), jnp.float32)

    # Deterministic random symmetric graph.
    src = jax.random.randint(ke, (E,), 0, N)
    dst = jax.random.randint(jax.random.fold_in(ke, 1), (E,), 0, N)
    edge_index = jnp.stack([jnp.concatenate([src, dst]),
                            jnp.concatenate([dst, src])], axis=0)   # [2, 2E]
    s_bf16 = build_sgc_propagation(edge_index, N)

    # SGConv's Linear(num_features, num_classes): glorot-uniform weight, zero bias.
    lim = (6.0 / (F_IN + C)) ** 0.5
    w = jax.random.uniform(kw, (F_IN, C), jnp.float32, minval=-lim, maxval=lim)
    b = jnp.zeros((1, C), jnp.float32)

    out = sgc_forward(x, s_bf16, w, b)
    jax.block_until_ready(out)

    # Sanity checks.
    assert out.shape == (N, C) and out.dtype == jnp.float32
    assert bool(jnp.all(jnp.isfinite(out)))
    assert bool(jnp.allclose(jnp.sum(jnp.exp(out), axis=1), 1.0, atol=1e-3))

    # Pure-JAX reference (same bf16-quantized S; original matmul order).
    s32 = s_bf16.astype(jnp.float32)
    ref = jax.nn.log_softmax((s32 @ (s32 @ x)) @ w + b, axis=1)
    assert bool(jnp.max(jnp.abs(out - ref)) < 5e-2)

    print("KERNEL_OK")
</pallas_src>

<mosaic_0001>
module attributes {stable_mosaic.version = 11 : i64} {
  func.func @sgc_kernel(%arg0: memref<64x64xbf16, #tpu.memory_space<vmem>>, %arg1: memref<64x16xf32, #tpu.memory_space<vmem>>, %arg2: memref<16x8xf32, #tpu.memory_space<vmem>>, %arg3: memref<1x8xf32, #tpu.memory_space<vmem>>, %arg4: memref<64x8xf32, #tpu.memory_space<vmem>>) attributes {dimension_semantics = [], scalar_prefetch = 0 : i64, scratch_operands = 0 : i64, tpu.core_type = #tpu.core_type<tc>} {
    %c0 = arith.constant 0 : index
    %c0_0 = arith.constant 0 : index
    %0 = vector.load %arg0[%c0, %c0_0] : memref<64x64xbf16, #tpu.memory_space<vmem>>, vector<64x64xbf16>
    %c0_1 = arith.constant 0 : index
    %c0_2 = arith.constant 0 : index
    %1 = vector.load %arg1[%c0_1, %c0_2] : memref<64x16xf32, #tpu.memory_space<vmem>>, vector<64x16xf32>
    %2 = arith.truncf %1 : vector<64x16xf32> to vector<64x16xbf16>
    %c0_3 = arith.constant 0 : index
    %c0_4 = arith.constant 0 : index
    %3 = vector.load %arg2[%c0_3, %c0_4] : memref<16x8xf32, #tpu.memory_space<vmem>>, vector<16x8xf32>
    %4 = arith.truncf %3 : vector<16x8xf32> to vector<16x8xbf16>
    %cst = arith.constant dense<0.000000e+00> : vector<64x8xf32>
    %5 = tpu.matmul %2, %4, %cst {dimension_numbers = #tpu.dot_dimension_numbers<[1], [0], [0], [1], [0, 0, 1, 1], [], []>} : vector<64x16xbf16>, vector<16x8xbf16>, vector<64x8xf32> -> vector<64x8xf32>
    %6 = arith.truncf %5 : vector<64x8xf32> to vector<64x8xbf16>
    %cst_5 = arith.constant dense<0.000000e+00> : vector<64x8xf32>
    %7 = tpu.matmul %0, %6, %cst_5 {dimension_numbers = #tpu.dot_dimension_numbers<[1], [0], [0], [1], [0, 0, 1, 1], [], []>} : vector<64x64xbf16>, vector<64x8xbf16>, vector<64x8xf32> -> vector<64x8xf32>
    %8 = arith.truncf %7 : vector<64x8xf32> to vector<64x8xbf16>
    %cst_6 = arith.constant dense<0.000000e+00> : vector<64x8xf32>
    %9 = tpu.matmul %0, %8, %cst_6 {dimension_numbers = #tpu.dot_dimension_numbers<[1], [0], [0], [1], [0, 0, 1, 1], [], []>} : vector<64x64xbf16>, vector<64x8xbf16>, vector<64x8xf32> -> vector<64x8xf32>
    %c0_7 = arith.constant 0 : index
    %c0_8 = arith.constant 0 : index
    %10 = vector.load %arg3[%c0_7, %c0_8] : memref<1x8xf32, #tpu.memory_space<vmem>>, vector<1x8xf32>
    %11 = vector.broadcast %10 : vector<1x8xf32> to vector<64x8xf32>
    %12 = arith.addf %9, %11 : vector<64x8xf32>
    %cst_9 = arith.constant dense<0xFF800000> : vector<64xf32>
    %13 = vector.multi_reduction <maximumf>, %12, %cst_9 [1] : vector<64x8xf32> to vector<64xf32>
    %14 = vector.shape_cast %13 : vector<64xf32> to vector<64x1xf32>
    %15 = vector.broadcast %14 : vector<64x1xf32> to vector<64x8xf32>
    %16 = arith.subf %12, %15 : vector<64x8xf32>
    %17 = math.exp %16 : vector<64x8xf32>
    %cst_10 = arith.constant dense<0.000000e+00> : vector<64xf32>
    %18 = vector.multi_reduction <add>, %17, %cst_10 [1] : vector<64x8xf32> to vector<64xf32>
    %19 = vector.shape_cast %18 : vector<64xf32> to vector<64x1xf32>
    %20 = math.log %19 : vector<64x1xf32>
    %21 = vector.broadcast %20 : vector<64x1xf32> to vector<64x8xf32>
    %22 = arith.subf %16, %21 : vector<64x8xf32>
    %c0_11 = arith.constant 0 : index
    %c0_12 = arith.constant 0 : index
    %23 = vector.load %arg4[%c0_11, %c0_12] : memref<64x8xf32, #tpu.memory_space<vmem>>, vector<64x8xf32>
    tpu.vector_store %arg4[%c0_11, %c0_12], %22 {strides = array<i32>} : memref<64x8xf32, #tpu.memory_space<vmem>>, vector<64x8xf32>,
    return
  }
}

</mosaic_0001>

<bundles_post_ra>
// kernel: tpu_custom_call.1
= control target key start
LH: loop header
LB: loop body
LE: loop exit
PB: predicated region body
PF: predicated region fallthrough
CT: control target
= control target key end

     0   :  { %vm41_vm0 = vcmask 130048   ;;  %vm143_vm1 = vcmask 523264   ;;  %vm297_vm2 = vcmask 64512   ;;  %s684_s2 = inlined_call_operand.vmem [shape: f32[16,8], index: 2, kind: input, shape index: {}]   ;;  %s685_s1 = inlined_call_operand.vmem [shape: f32[64,16], index: 1, kind: input, shape index: {}]   ;;  %s686_s0 = inlined_call_operand.vmem [shape: bf16[64,64], index: 0, kind: input, shape index: {}]   ;;  %s687_s3 = inlined_call_operand.vmem [shape: f32[1,8], index: 3, kind: input, shape index: {}]   ;;  %s688_s4 = inlined_call_operand.vmem [shape: f32[64,8], index: 4, kind: output, shape index: {}]  }
   0x1   :  { %v38_v0 = vld [vmem:[%s684_s2] sm:$0xff]  ;;  %v39_v1 = vld [vmem:[%s684_s2 + $0x8] sm:$0xff]  ;;  %v28_v5 = vld [vmem:[%s685_s1 + $0x10] sm:$0xff] }
   0x2   :  { %v26_v2 = vld [vmem:[%s685_s1] sm:$0xff]  ;;  %v40_v3 = vpack.c.bf16 %v39_v1, %v38_v0  ;;  %v27_v4 = vld [vmem:[%s685_s1 + $0x8] sm:$0xff]  ;;  %v29_v6 = vld [vmem:[%s685_s1 + $0x18] sm:$0xff] }
   0x3   :  { %v34_v7 = vpack.c.bf16 %v27_v4, %v26_v2  ;;  %v30_v8 = vld [vmem:[%s685_s1 + $0x20] sm:$0xff]  ;;  %v31_v9 = vld [vmem:[%s685_s1 + $0x28] sm:$0xff]  ;;  %v35_v10 = vpack.c.bf16 %v29_v6, %v28_v5  ;;  %v32_v12 = vld [vmem:[%s685_s1 + $0x30] sm:$0xff] }
   0x4   :  { %444 = vmatprep.subr.bf16.mxu0 %v40_v3  ;;  %v36_v11 = vpack.c.bf16 %v31_v9, %v30_v8  ;;  %v33_v13 = vld [vmem:[%s685_s1 + $0x38] sm:$0xff]  ;;  %v486_v15 = vld [vmem:[%s686_s0] sm:$0xff]   ;;  %v487_v28 = vld [vmem:[%s686_s0 + $0x8] sm:$0xff]  }
   0x5   :  { %445 = vmatpush3.bf16.msra.mxu0 %v40_v3  ;;  %446 = vmatprep.mubr.msk.bf16.mxu0 %vm41_vm0, %v34_v7  ;;  %v37_v14 = vpack.c.bf16 %v33_v13, %v32_v12  ;;  %v488_v29 = vld [vmem:[%s686_s0 + $0x10] sm:$0xff]   ;;  %v489_v30 = vld [vmem:[%s686_s0 + $0x18] sm:$0xff]   ;;  %v418_v43 = vld [vmem:[%s687_s3] ss:$0 sm:$0xff] }
   0x6   :  { %462 = vmatprep.mubr.msk.bf16.mxu1 %vm143_vm1, %v486_v15 }
   0x8   :  { %447 = vmatmul.mubr.msk.bf16.vlgmr.msra.gmra.mxu0 %vm41_vm0, %v35_v10 }
   0x9   :  { %450 = vmatprep.mubr.msk.bf16.mxu0 %vm41_vm0, %v36_v11 }
  0x10   :  { %451 = vmatmul.mubr.msk.bf16.gmra.mxu0 %vm41_vm0, %v37_v14 }
  0x11   :  { %478 = vmatprep.mubr.msk.bf16.mxu0 %vm143_vm1, %v486_v15 }
  0xc8   :  { %v448_v16 = vpop.f32.mrf.mxu0 }
  0xca   :  { %v88_v17 = vpop.f32.mrf.mxu0 }
  0xcc   :  { %v449_v18 = vpop.f32.mrf.mxu0 }
  0xcd   :  { %v120_v26 = vpack.c.bf16 %v449_v18, %v448_v16 }
  0xce   :  { %v91_v19 = vpop.f32.mrf.mxu0 }
  0xcf   :  { %v119_v27 = vpack.c.bf16 %v91_v19, %v88_v17 }
  0xd0   :  { %v452_v20 = vpop.f32.mrf.mxu0 }
  0xd2   :  { %v104_v21 = vpop.f32.mrf.mxu0 }
  0xd4   :  { %v453_v22 = vpop.f32.mrf.mxu0 }
  0xd5   :  { %v122_v23 = vpack.c.bf16 %v453_v22, %v452_v20 }
  0xd6   :  { %v107_v24 = vpop.f32.mrf.mxu0 }
  0xd7   :  { %v121_v25 = vpack.c.bf16 %v107_v24, %v104_v21  ;;  %454 = vmatprep.subr.bf16.mxu1 %v122_v23 }
  0xd8   :  { %455 = vmatpush3.bf16.msra.mxu1 %v122_v23 }
  0xd9   :  { %456 = vmatprep.subr.bf16.mxu1 %v121_v25 }
  0xdc   :  { %457 = vmatpush3.bf16.msra.mxu1 %v121_v25 }
  0xdd   :  { %458 = vmatprep.subr.bf16.mxu1 %v120_v26 }
  0xe0   :  { %459 = vmatpush3.bf16.msra.mxu1 %v120_v26 }
  0xe1   :  { %460 = vmatprep.subr.bf16.mxu1 %v119_v27 }
  0xe4   :  { %461 = vmatpush3.bf16.msra.mxu1 %v119_v27 }
  0xe7   :  { %463 = vmatmul.mubr.msk.bf16.vlgmr.msra.gmra.mxu1 %vm143_vm1, %v487_v28 }
  0xe8   :  { %466 = vmatprep.mubr.msk.bf16.mxu1 %vm143_vm1, %v488_v29 }
  0xef   :  { %467 = vmatmul.mubr.msk.bf16.gmra.mxu1 %vm143_vm1, %v489_v30 }
 0x1a7   :  { %v464_v31 = vpop.f32.mrf.mxu1 }
 0x1a9   :  { %v190_v32 = vpop.f32.mrf.mxu1 }
 0x1ab   :  { %v465_v33 = vpop.f32.mrf.mxu1 }
 0x1ac   :  { %v222_v41 = vpack.c.bf16 %v465_v33, %v464_v31 }
 0x1ad   :  { %v193_v34 = vpop.f32.mrf.mxu1 }
 0x1ae   :  { %v221_v42 = vpack.c.bf16 %v193_v34, %v190_v32 }
 0x1af   :  { %v468_v35 = vpop.f32.mrf.mxu1 }
 0x1b1   :  { %v206_v36 = vpop.f32.mrf.mxu1 }
 0x1b3   :  { %v469_v37 = vpop.f32.mrf.mxu1 }
 0x1b4   :  { %v224_v38 = vpack.c.bf16 %v469_v37, %v468_v35 }
 0x1b5   :  { %v209_v39 = vpop.f32.mrf.mxu1 }
 0x1b6   :  { %v223_v40 = vpack.c.bf16 %v209_v39, %v206_v36  ;;  %470 = vmatprep.subr.bf16.mxu0 %v224_v38 }
 0x1b7   :  { %471 = vmatpush3.bf16.msra.mxu0 %v224_v38 }
 0x1b8   :  { %472 = vmatprep.subr.bf16.mxu0 %v223_v40 }
 0x1bb   :  { %473 = vmatpush3.bf16.msra.mxu0 %v223_v40 }
 0x1bc   :  { %474 = vmatprep.subr.bf16.mxu0 %v222_v41 }
 0x1bf   :  { %475 = vmatpush3.bf16.msra.mxu0 %v222_v41 }
 0x1c0   :  { %476 = vmatprep.subr.bf16.mxu0 %v221_v42 }
 0x1c3   :  { %477 = vmatpush3.bf16.msra.mxu0 %v221_v42 }
 0x1c6   :  { %479 = vmatmul.mubr.msk.bf16.vlgmr.msra.gmra.mxu0 %vm143_vm1, %v487_v28 }
 0x1c7   :  { %482 = vmatprep.mubr.msk.bf16.mxu0 %vm143_vm1, %v488_v29 }
 0x1ce   :  { %483 = vmatmul.mubr.msk.bf16.gmra.mxu0 %vm143_vm1, %v489_v30 }
 0x286   :  { %v480_v44 = vpop.f32.mrf.mxu0 }
 0x287   :  { %v275_v45 = vadd.f32 %v480_v44, %v418_v43 }
 0x288   :  { %v266_v46 = vpop.f32.mrf.mxu0 }
 0x289   :  { %v267_v47 = vadd.f32 %v418_v43, %v266_v46  ;;  %v304_v48 = vsel %vm297_vm2, %v275_v45, -inf }
 0x28a   :  { %305 = vmax.xlane.f32.xlu1 %v304_v48  ;;  %v481_v49 = vpop.f32.mrf.mxu0 }
 0x28b   :  { %v278_v50 = vadd.f32 %v481_v49, %v418_v43  ;;  %v298_v51 = vsel %vm297_vm2, %v267_v47, -inf }
 0x28c   :  { %v269_v52 = vpop.f32.mrf.mxu0  ;;  %299 = vmax.xlane.f32.xlu0 %v298_v51 }
 0x28d   :  { %v270_v53 = vadd.f32 %v418_v43, %v269_v52  ;;  %v307_v54 = vsel %vm297_vm2, %v278_v50, -inf }
 0x28e   :  { %308 = vmax.xlane.f32.xlu1 %v307_v54  ;;  %v484_v55 = vpop.f32.mrf.mxu0 }
 0x28f   :  { %v301_v56 = vsel %vm297_vm2, %v270_v53, -inf  ;;  %v291_v60 = vadd.f32 %v484_v55, %v418_v43 }
 0x290   :  { %v282_v57 = vpop.f32.mrf.mxu0  ;;  %302 = vmax.xlane.f32.xlu0 %v301_v56 }
 0x291   :  { %v283_v58 = vadd.f32 %v418_v43, %v282_v57  ;;  %v316_v2 = vsel %vm297_vm2, %v291_v60, -inf }
 0x292   :  { %v485_v59 = vpop.f32.mrf.mxu0 }
 0x293   :  { %v310_v61 = vsel %vm297_vm2, %v283_v58, -inf  ;;  %v294_v0 = vadd.f32 %v485_v59, %v418_v43 }
 0x294   :  { %v285_v62 = vpop.f32.mrf.mxu0  ;;  %311 = vmax.xlane.f32.xlu0 %v310_v61 }
 0x295   :  { %v286_v63 = vadd.f32 %v418_v43, %v285_v62  ;;  %v319_v3 = vsel %vm297_vm2, %v294_v0, -inf }
 0x297   :  { %v313_v1 = vsel %vm297_vm2, %v286_v63, -inf }
 0x298   :  { %314 = vmax.xlane.f32.xlu1 %v313_v1  ;;  %317 = vmax.xlane.f32.xlu0 %v316_v2 }
 0x29c   :  { %320 = vmax.xlane.f32.xlu1 %v319_v3 }
 0x313   :  { %v306_v4 = vpop.xlane.xlu1 %305 }
 0x314   :  { %v612_v5 = vsub.f32 %v275_v45, %v306_v4 }
 0x315   :  { %v300_v6 = vpop.xlane.xlu0 %299 }
 0x316   :  { %v334_v7 = vmul.f32 1.442695, %v612_v5  ;;  %v615_v8 = vsub.f32 %v267_v47, %v300_v6 }
 0x317   :  { %v309_v9 = vpop.xlane.xlu1 %308 }
 0x318   :  { %490 = vpow2.f32 %v334_v7  ;;  %v330_v10 = vmul.f32 1.442695, %v615_v8  ;;  %v618_v11 = vsub.f32 %v278_v50, %v309_v9 }
 0x319   :  { %v303_v12 = vpop.xlane.xlu0 %302 }
 0x31a   :  { %492 = vpow2.f32 %v330_v10  ;;  %v336_v13 = vmul.f32 1.442695, %v618_v11  ;;  %v621_v14 = vsub.f32 %v270_v53, %v303_v12 }
 0x31c   :  { %494 = vpow2.f32 %v336_v13  ;;  %v332_v15 = vmul.f32 1.442695, %v621_v14 }
 0x31d   :  { %v312_v16 = vpop.xlane.xlu0 %311 }
 0x31e   :  { %496 = vpow2.f32 %v332_v15  ;;  %v624_v17 = vsub.f32 %v283_v58, %v312_v16 }
 0x320   :  { %v338_v18 = vmul.f32 1.442695, %v624_v17 }
 0x321   :  { %v315_v19 = vpop.xlane.xlu1 %314  ;;  %v318_v20 = vpop.xlane.xlu0 %317 }
 0x322   :  { %498 = vpow2.f32 %v338_v18  ;;  %v627_v21 = vsub.f32 %v286_v63, %v315_v19  ;;  %v629_v22 = vsub.f32 %v291_v60, %v318_v20 }
 0x324   :  { %v340_v23 = vmul.f32 1.442695, %v627_v21  ;;  %v342_v24 = vmul.f32 1.442695, %v629_v22 }
 0x325   :  { %v491_v25 = vpop.eup %490  ;;  %v321_v26 = vpop.xlane.xlu1 %320 }
 0x326   :  { %500 = vpow2.f32 %v340_v23  ;;  %v633_v27 = vsub.f32 %v294_v0, %v321_v26  ;;  %v352_v28 = vsel %vm297_vm2, %v491_v25, 0.0 }
 0x327   :  { %v493_v29 = vpop.eup %492  ;;  %502 = vpow2.f32 %v342_v24  ;;  %353 = vadd.xlane.f32.xlu0 %v352_v28 }
 0x328   :  { %v344_v30 = vmul.f32 1.442695, %v633_v27  ;;  %v346_v33 = vsel %vm297_vm2, %v493_v29, 0.0 }
 0x329   :  { %v495_v31 = vpop.eup %494 }
 0x32a   :  { %504 = vpow2.f32 %v344_v30  ;;  %v355_v32 = vsel %vm297_vm2, %v495_v31, 0.0 }
 0x32b   :  { %v497_v34 = vpop.eup %496  ;;  %356 = vadd.xlane.f32.xlu1 %v355_v32  ;;  %347 = vadd.xlane.f32.xlu0 %v346_v33 }
 0x32c   :  { %v349_v35 = vsel %vm297_vm2, %v497_v34, 0.0 }
 0x32f   :  { %v499_v36 = vpop.eup %498  ;;  %350 = vadd.xlane.f32.xlu1 %v349_v35 }
 0x330   :  { %v358_v37 = vsel %vm297_vm2, %v499_v36, 0.0 }
 0x331   :  { %359 = vadd.xlane.f32.xlu0 %v358_v37 }
 0x333   :  { %v501_v38 = vpop.eup %500 }
 0x334   :  { %v503_v39 = vpop.eup %502  ;;  %v361_v40 = vsel %vm297_vm2, %v501_v38, 0.0 }
 0x335   :  { %362 = vadd.xlane.f32.xlu1 %v361_v40  ;;  %v364_v41 = vsel %vm297_vm2, %v503_v39, 0.0 }
 0x336   :  { %365 = vadd.xlane.f32.xlu0 %v364_v41 }
 0x337   :  { %v505_v42 = vpop.eup %504 }
 0x338   :  { %v367_v43 = vsel %vm297_vm2, %v505_v42, 0.0 }
 0x339   :  { %368 = vadd.xlane.f32.xlu1 %v367_v43 }
 0x3b0   :  { %v354_v44 = vpop.xlane.xlu0 %353 }
 0x3b1   :  { %506 = vlog2.f32 %v354_v44 }
 0x3b4   :  { %v357_v45 = vpop.xlane.xlu1 %356  ;;  %v348_v46 = vpop.xlane.xlu0 %347 }
 0x3b5   :  { %508 = vlog2.f32 %v357_v45 }
 0x3b6   :  { %510 = vlog2.f32 %v348_v46 }
 0x3b8   :  { %v351_v47 = vpop.xlane.xlu1 %350 }
 0x3b9   :  { %512 = vlog2.f32 %v351_v47 }
 0x3ba   :  { %v360_v48 = vpop.xlane.xlu0 %359 }
 0x3bb   :  { %514 = vlog2.f32 %v360_v48 }
 0x3be   :  { %v507_v49 = vpop.eup %506  ;;  %v363_v50 = vpop.xlane.xlu1 %362 }
 0x3bf   :  { %v375_v51 = vmul.f32 0.6931472, %v507_v49  ;;  %516 = vlog2.f32 %v363_v50  ;;  %v366_v52 = vpop.xlane.xlu0 %365 }
 0x3c0   :  { %518 = vlog2.f32 %v366_v52 }
 0x3c1   :  { %v388_v53 = vsub.f32 %v612_v5, %v375_v51 }
 0x3c2   :  { %v509_v54 = vpop.eup %508  ;;  %v369_v55 = vpop.xlane.xlu1 %368 }
 0x3c3   :  { %v511_v56 = vpop.eup %510  ;;  %396 = vst.msk [vmem:[%s688_s4 + $0x10] sm:$0xff] %vm297_vm2, %v388_v53  ;;  %v377_v57 = vmul.f32 0.6931472, %v509_v54  ;;  %520 = vlog2.f32 %v369_v55 }
 0x3c4   :  { %v371_v58 = vmul.f32 0.6931472, %v511_v56 }
 0x3c5   :  { %v389_v59 = vsub.f32 %v618_v11, %v377_v57 }
 0x3c6   :  { %v513_v60 = vpop.eup %512  ;;  %v386_v61 = vsub.f32 %v615_v8, %v371_v58 }
 0x3c7   :  { %397 = vst.msk [vmem:[%s688_s4 + $0x18] sm:$0xff] %vm297_vm2, %v389_v59  ;;  %v373_v62 = vmul.f32 0.6931472, %v513_v60 }
 0x3c8   :  { %v515_v63 = vpop.eup %514  ;;  %394 = vst.msk [vmem:[%s688_s4] sm:$0xff] %vm297_vm2, %v386_v61 }
 0x3c9   :  { %v387_v0 = vsub.f32 %v621_v14, %v373_v62  ;;  %v379_v1 = vmul.f32 0.6931472, %v515_v63 }
 0x3cb   :  { %395 = vst.msk [vmem:[%s688_s4 + $0x8] sm:$0xff] %vm297_vm2, %v387_v0  ;;  %v390_v2 = vsub.f32 %v624_v17, %v379_v1 }
 0x3cc   :  { %v517_v3 = vpop.eup %516 }
 0x3cd   :  { %v519_v4 = vpop.eup %518  ;;  %398 = vst.msk [vmem:[%s688_s4 + $0x20] sm:$0xff] %vm297_vm2, %v390_v2  ;;  %v381_v5 = vmul.f32 0.6931472, %v517_v3 }
 0x3ce   :  { %v383_v6 = vmul.f32 0.6931472, %v519_v4 }
 0x3cf   :  { %v391_v7 = vsub.f32 %v627_v21, %v381_v5 }
 0x3d0   :  { %v521_v8 = vpop.eup %520  ;;  %v392_v9 = vsub.f32 %v629_v22, %v383_v6 }
 0x3d1   :  { %399 = vst.msk [vmem:[%s688_s4 + $0x28] sm:$0xff] %vm297_vm2, %v391_v7  ;;  %v385_v10 = vmul.f32 0.6931472, %v521_v8 }
 0x3d2   :  { %400 = vst.msk [vmem:[%s688_s4 + $0x30] sm:$0xff] %vm297_vm2, %v392_v9 }
 0x3d3   :  { %v393_v11 = vsub.f32 %v633_v27, %v385_v10 }
 0x3d5   :  { %401 = vst.msk [vmem:[%s688_s4 + $0x38] sm:$0xff] %vm297_vm2, %v393_v11 }

</bundles_post_ra>
